<compile_context>
chip_gen: v7x
topology: tpu7x:2x2x1
jax: 0.10.0
libtpu: 0.0.40
codegen_flags: <defaults>
</compile_context>

<pallas_src>
import jax
import jax.numpy as jnp
from jax.experimental import pallas as pl
from jax.experimental.pallas import tpu as pltpu


def _lm_criterion_kernel(inp_ref, tgt_ref, mask_ref, out_ref, acc_ref):
    """Grid = (row_blocks, vocab_blocks). Vocab axis is the reduction axis."""
    j = pl.program_id(1)
    tile_v = inp_ref.shape[1]

    @pl.when(j == 0)
    def _():
        acc_ref[...] = jnp.zeros_like(acc_ref)

    logp = inp_ref[...]                                         # (tile_n, tile_v) native dtype
    tgt = tgt_ref[...]                                          # (tile_n, 1) int32
    col = jax.lax.broadcasted_iota(jnp.int32, logp.shape, 1) + j * tile_v
    picked = jnp.where(col == tgt, logp, jnp.zeros_like(logp))  # at most one hit per row
    acc_ref[...] += jnp.sum(picked, axis=1, keepdims=True).astype(jnp.float32)

    @pl.when(j == pl.num_programs(1) - 1)
    def _():
        m = mask_ref[...].astype(jnp.float32)                   # (tile_n, 1)
        out_ref[...] = -acc_ref[...] * m                        # per-row partial loss


def language_model_criterion(inp, target, mask):
    """inp: (B, T, V) log-probs (f32 or bf16); target: (B, T) ints; mask: (B, T) floats."""
    B, T, V = inp.shape
    # Replicate PyTorch's implicit truncation of target/mask to input's time dim.
    target = target[:, :T]
    mask = mask[:, :T]

    N = B * T
    itemsize = jnp.dtype(inp.dtype).itemsize

    # ---- tile selection -------------------------------------------------
    # Row tile: up to 256 rows; keep it a multiple of the sublane granule
    # (16 covers both bf16 and f32 packing when N is large enough).
    row_granule = 16 if itemsize < 4 else 8
    tile_n = min(256, pl.cdiv(N, row_granule) * row_granule)

    # Vocab tile: ~4 MiB per input buffer (double-buffered -> ~8 MiB VMEM),
    # lane-aligned to 128.
    target_bytes = 4 * 1024 * 1024
    v_padded_128 = pl.cdiv(V, 128) * 128
    tile_v = max(128, min(v_padded_128,
                          (target_bytes // (tile_n * itemsize)) // 128 * 128))

    Np = pl.cdiv(N, tile_n) * tile_n
    Vp = pl.cdiv(v_padded_128, tile_v) * tile_v

    # ---- flatten + pad --------------------------------------------------
    inp2 = inp.reshape(N, V)                          # keep native dtype (no f32 upcast)
    tgt2 = target.reshape(N, 1).astype(jnp.int32)
    mask2 = mask.reshape(N, 1).astype(jnp.float32)
    if Np != N or Vp != V:
        inp2 = jnp.pad(inp2, ((0, Np - N), (0, Vp - V)))
        tgt2 = jnp.pad(tgt2, ((0, Np - N), (0, 0)))   # padded targets = 0 (in range)
        mask2 = jnp.pad(mask2, ((0, Np - N), (0, 0)))  # padded mask = 0 -> no contribution

    grid = (Np // tile_n, Vp // tile_v)

    cost = pl.CostEstimate(
        flops=2 * N * V,
        transcendentals=0,
        bytes_accessed=Np * Vp * itemsize + Np * (4 + 4 + 4),
    )

    partials = pl.pallas_call(
        _lm_criterion_kernel,
        out_shape=jax.ShapeDtypeStruct((Np, 1), jnp.float32),
        grid_spec=pltpu.PrefetchScalarGridSpec(
            num_scalar_prefetch=0,
            grid=grid,
            in_specs=[
                pl.BlockSpec((tile_n, tile_v), lambda i, j: (i, j)),
                pl.BlockSpec((tile_n, 1), lambda i, j: (i, 0)),
                pl.BlockSpec((tile_n, 1), lambda i, j: (i, 0)),
            ],
            out_specs=pl.BlockSpec((tile_n, 1), lambda i, j: (i, 0)),
            scratch_shapes=[pltpu.VMEM((tile_n, 1), jnp.float32)],
        ),
        compiler_params=pltpu.CompilerParams(
            dimension_semantics=("parallel", "arbitrary"),
            vmem_limit_bytes=32 * 1024 * 1024,
        ),
        cost_estimate=cost,
    )(inp2, tgt2, mask2)

    num = jnp.sum(partials)          # padded rows contribute exactly 0
    den = jnp.sum(mask2)             # den = sum(mask); trivial, done in XLA
    return (num / den).astype(inp.dtype)


def _reference(inp, target, mask):
    """Pure-JAX reference matching the PyTorch module."""
    B, T, V = inp.shape
    inp2 = inp.reshape(-1, V).astype(jnp.float32)
    tgt2 = target.reshape(-1)
    m2 = mask.reshape(-1).astype(jnp.float32)
    gathered = jnp.take_along_axis(inp2, tgt2[:, None], axis=1)[:, 0]
    return jnp.sum(-gathered * m2) / jnp.sum(m2)


if __name__ == "__main__":
    key = jax.random.PRNGKey(0)
    k1, k2, k3 = jax.random.split(key, 3)

    B, T, V = 2, 8, 32
    logits = jax.random.normal(k1, (B, T, V), dtype=jnp.float32)
    log_probs = jax.nn.log_softmax(logits, axis=-1)
    target = jax.random.randint(k2, (B, T), 0, V, dtype=jnp.int32)
    # mask: ones for a prefix of each sequence (typical LM usage)
    lens = jax.random.randint(k3, (B,), 1, T + 1)
    mask = (jnp.arange(T)[None, :] < lens[:, None]).astype(jnp.float32)

    out = language_model_criterion(log_probs, target, mask)
    out = jax.block_until_ready(out)

    ref = _reference(log_probs, target, mask)
    assert jnp.allclose(out, ref, rtol=1e-5, atol=1e-5), (out, ref)

    print("KERNEL_OK")
</pallas_src>

<mosaic_0001>
module attributes {stable_mosaic.version = 11 : i64} {
  func.func @_lm_criterion_kernel(%arg0: i32, %arg1: i32, %arg2: memref<16x128xf32, #tpu.memory_space<vmem>>, %arg3: memref<16x1xi32, #tpu.memory_space<vmem>>, %arg4: memref<16x1xf32, #tpu.memory_space<vmem>>, %arg5: memref<16x1xf32, #tpu.memory_space<vmem>>, %arg6: memref<16x1xf32, #tpu.memory_space<vmem>>) attributes {dimension_semantics = [#tpu.dimension_semantics<parallel>, #tpu.dimension_semantics<arbitrary>], iteration_bounds = array<i64: 1, 1>, scalar_prefetch = 0 : i64, scratch_operands = 1 : i64, tpu.core_type = #tpu.core_type<tc>, window_params = [{transform_indices = @transform_0, window_bounds = array<i64: 16, 128>}, {transform_indices = @transform_1, window_bounds = array<i64: 16, 1>}, {transform_indices = @transform_2, window_bounds = array<i64: 16, 1>}, {transform_indices = @transform_3, window_bounds = array<i64: 16, 1>}]} {
    %c0_i32 = arith.constant 0 : i32
    %0 = arith.cmpi eq, %arg1, %c0_i32 : i32
    %1 = arith.extui %0 : i1 to i32
    %c0_i32_0 = arith.constant 0 : i32
    %2 = arith.cmpi ne, %1, %c0_i32_0 : i32
    scf.if %2 {
      %cst_11 = arith.constant 0.000000e+00 : f32
      %21 = vector.broadcast %cst_11 : f32 to vector<16x1xf32>
      %c0_12 = arith.constant 0 : index
      %c0_13 = arith.constant 0 : index
      %22 = vector.load %arg6[%c0_12, %c0_13] : memref<16x1xf32, #tpu.memory_space<vmem>>, vector<16x1xf32>
      tpu.vector_store %arg6[%c0_12, %c0_13], %21 {strides = array<i32>} : memref<16x1xf32, #tpu.memory_space<vmem>>, vector<16x1xf32>,
    } else {
    }
    %c0 = arith.constant 0 : index
    %c0_1 = arith.constant 0 : index
    %3 = vector.load %arg2[%c0, %c0_1] : memref<16x128xf32, #tpu.memory_space<vmem>>, vector<16x128xf32>
    %c0_2 = arith.constant 0 : index
    %c0_3 = arith.constant 0 : index
    %4 = vector.load %arg3[%c0_2, %c0_3] : memref<16x1xi32, #tpu.memory_space<vmem>>, vector<16x1xi32>
    %5 = tpu.iota {dimensions = array<i32: 1>} : vector<16x128xi32>
    %c128_i32 = arith.constant 128 : i32
    %6 = arith.muli %arg1, %c128_i32 : i32
    %7 = vector.broadcast %6 : i32 to vector<16x128xi32>
    %8 = arith.addi %5, %7 : vector<16x128xi32>
    %9 = vector.broadcast %4 : vector<16x1xi32> to vector<16x128xi32>
    %10 = arith.cmpi eq, %8, %9 : vector<16x128xi32>
    %cst = arith.constant 0.000000e+00 : f32
    %11 = vector.broadcast %cst : f32 to vector<16x128xf32>
    %12 = arith.select %10, %3, %11 : vector<16x128xi1>, vector<16x128xf32>
    %c0_4 = arith.constant 0 : index
    %c0_5 = arith.constant 0 : index
    %13 = vector.load %arg6[%c0_4, %c0_5] : memref<16x1xf32, #tpu.memory_space<vmem>>, vector<16x1xf32>
    %cst_6 = arith.constant dense<0.000000e+00> : vector<16xf32>
    %14 = vector.multi_reduction <add>, %12, %cst_6 [1] : vector<16x128xf32> to vector<16xf32>
    %15 = vector.shape_cast %14 : vector<16xf32> to vector<16x1xf32>
    %16 = arith.addf %13, %15 : vector<16x1xf32>
    %c0_7 = arith.constant 0 : index
    %c0_8 = arith.constant 0 : index
    %17 = vector.load %arg6[%c0_7, %c0_8] : memref<16x1xf32, #tpu.memory_space<vmem>>, vector<16x1xf32>
    tpu.vector_store %arg6[%c0_7, %c0_8], %16 {strides = array<i32>} : memref<16x1xf32, #tpu.memory_space<vmem>>, vector<16x1xf32>,
    %c0_i32_9 = arith.constant 0 : i32
    %18 = arith.cmpi eq, %arg1, %c0_i32_9 : i32
    %19 = arith.extui %18 : i1 to i32
    %c0_i32_10 = arith.constant 0 : i32
    %20 = arith.cmpi ne, %19, %c0_i32_10 : i32
    scf.if %20 {
      %c0_11 = arith.constant 0 : index
      %c0_12 = arith.constant 0 : index
      %21 = vector.load %arg4[%c0_11, %c0_12] : memref<16x1xf32, #tpu.memory_space<vmem>>, vector<16x1xf32>
      %c0_13 = arith.constant 0 : index
      %c0_14 = arith.constant 0 : index
      %22 = vector.load %arg6[%c0_13, %c0_14] : memref<16x1xf32, #tpu.memory_space<vmem>>, vector<16x1xf32>
      %cst_15 = arith.constant 0.000000e+00 : f32
      %23 = vector.broadcast %cst_15 : f32 to vector<16x1xf32>
      %24 = arith.subf %23, %22 : vector<16x1xf32>
      %25 = arith.mulf %24, %21 : vector<16x1xf32>
      %c0_16 = arith.constant 0 : index
      %c0_17 = arith.constant 0 : index
      %26 = vector.load %arg5[%c0_16, %c0_17] : memref<16x1xf32, #tpu.memory_space<vmem>>, vector<16x1xf32>
      tpu.vector_store %arg5[%c0_16, %c0_17], %25 {strides = array<i32>} : memref<16x1xf32, #tpu.memory_space<vmem>>, vector<16x1xf32>,
    } else {
    }
    return
  }
  func.func @transform_0(%arg0: i32, %arg1: i32) -> (i32, i32) {
    %c0_i32 = arith.constant 0 : i32
    return %arg0, %arg1 : i32, i32
  }
  func.func @transform_1(%arg0: i32, %arg1: i32) -> (i32, i32) {
    %c0_i32 = arith.constant 0 : i32
    %c0_i32_0 = arith.constant 0 : i32
    return %arg0, %c0_i32 : i32, i32
  }
  func.func @transform_2(%arg0: i32, %arg1: i32) -> (i32, i32) {
    %c0_i32 = arith.constant 0 : i32
    %c0_i32_0 = arith.constant 0 : i32
    return %arg0, %c0_i32 : i32, i32
  }
  func.func @transform_3(%arg0: i32, %arg1: i32) -> (i32, i32) {
    %c0_i32 = arith.constant 0 : i32
    %c0_i32_0 = arith.constant 0 : i32
    return %arg0, %c0_i32 : i32, i32
  }
}

</mosaic_0001>

<bundles_post_ra>
// kernel: tpu_custom_call.1
= control target key start
LH: loop header
LB: loop body
LE: loop exit
PB: predicated region body
PF: predicated region fallthrough
CT: control target
= control target key end

     0   :  { %v71_v0 = vmov 0   ;;  %vm18_vm0 = vcmask 7168   ;;  %v72_v3 = vmov 0.0   ;;  %v25_v4 = vlaneseq  ;;  %s123_s1 = inlined_call_operand.vmem [shape: s32[16,1], index: 1, kind: input, shape index: {}]   ;;  %s124_s0 = inlined_call_operand.vmem [shape: f32[16,128], index: 0, kind: input, shape index: {}]   ;;  %s125_s2 = inlined_call_operand.vmem [shape: f32[16,1], index: 2, kind: input, shape index: {}]   ;;  %s126_s3 = inlined_call_operand.vmem [shape: f32[16,1], index: 3, kind: output, shape index: {}]  }
   0x1   :  { %70 = vset.pattern.permute.xlu0 %v71_v0  ;;  %v23_v1 = vld [vmem:[%s123_s1] sm:$0xff]  ;;  %v24_v2 = vld [vmem:[%s123_s1 + $0x8] sm:$0xff]  ;;  %19 = vst.msk [vmem:[#allocation2] sm:$0xff] %vm18_vm0, %v72_v3  ;;  %20 = vst.msk [vmem:[#allocation2 + $0x8] sm:$0xff] %vm18_vm0, %v72_v3 }
   0x2   :  { %31 = vperm.xlu0 %70, %v23_v1   ;;  %v26_v5 = vand.u32 127, %v25_v4  ;;  %v21_v6 = vld [vmem:[%s124_s0] sm:$0xff]  ;;  %v22_v9 = vld [vmem:[%s124_s0 + $0x8] sm:$0xff] }
   0x3   :  { %v54_v18 = vld [vmem:[%s125_s2] sm:$0xff]  ;;  %v55_v22 = vld [vmem:[%s125_s2 + $0x8] sm:$0xff] }
   0x6   :  { %34 = vperm.xlu0 %70, %v24_v2  }
   0x8   :  { %v40_v12 = vld [vmem:[#allocation2] sm:$0xff]  ;;  %v41_v15 = vld [vmem:[#allocation2 + $0x8] sm:$0xff] }
  0x81   :  { %v32_v7 = vpop.permute.xlu0 %31 }
  0x82   :  { %vm36_vm1 = vcmp.eq.s32.totalorder %v26_v5, %v32_v7 }
  0x83   :  { %v38_v8 = vsel %vm36_vm1, %v21_v6, 0.0 }
  0x84   :  { %42 = vadd.xlane.f32.xlu1 %v38_v8 }
  0x85   :  { %v35_v10 = vpop.permute.xlu0 %34 }
  0x86   :  { %vm37_vm2 = vcmp.eq.s32.totalorder %v26_v5, %v35_v10 }
  0x87   :  { %v39_v11 = vsel %vm37_vm2, %v22_v9, 0.0 }
  0x88   :  { %44 = vadd.xlane.f32.xlu1 %v39_v11 }
 0x111   :  { %v43_v13 = vpop.xlane.xlu1 %42 }
 0x112   :  { %v46_v14 = vadd.f32 %v43_v13, %v40_v12 }
 0x114   :  { %49 = vst.msk [vmem:[#allocation2] sm:$0xff] %vm18_vm0, %v46_v14 }
 0x115   :  { %v45_v16 = vpop.xlane.xlu1 %44 }
 0x116   :  { %v47_v17 = vadd.f32 %v45_v16, %v41_v15 }
 0x118   :  { %50 = vst.msk [vmem:[#allocation2 + $0x8] sm:$0xff] %vm18_vm0, %v47_v17 }
 0x11b   :  { %v56_v19 = vld [vmem:[#allocation2] sm:$0xff] }
 0x11c   :  { %v58_v20 = vsub.f32 0.0, %v56_v19 }
 0x11e   :  { %v60_v21 = vmul.f32 %v58_v20, %v54_v18 }
 0x11f   :  { %v57_v23 = vld [vmem:[#allocation2 + $0x8] sm:$0xff] }
 0x120   :  { %62 = vst.msk [vmem:[%s126_s3] sm:$0xff] %vm18_vm0, %v60_v21  ;;  %v59_v24 = vsub.f32 0.0, %v57_v23 }
 0x122   :  { %v61_v25 = vmul.f32 %v59_v24, %v55_v22 }
 0x124   :  { %63 = vst.msk [vmem:[%s126_s3 + $0x8] sm:$0xff] %vm18_vm0, %v61_v25 }

</bundles_post_ra>
